<compile_context>
chip_gen: v5e
topology: v5e:2x2
jax: 0.10.0
libtpu: 0.0.40
codegen_flags: <defaults>
</compile_context>

<pallas_src>
import jax
import jax.numpy as jnp
from jax.experimental import pallas as pl
from jax.experimental.pallas import tpu as pltpu

D_IN, H1, H2, D_OUT = 1, 12, 8, 1

# --- packed-parameter layout: rows = feature index (sublanes), cols = slots --
P_ROWS = H1                       # 12 (>= H2)
C_W1, C_B1, C_B2, C_W3, C_B3 = 0, 1, 2, 3, 4
C_W2 = 5                          # columns 5..16 hold W2[:, j] for j = 0..11
P_COLS = C_W2 + H1                # 17


def _cdiv(a, b):
    return -(-a // b)


def _round_up(a, b):
    return _cdiv(a, b) * b


def pack_params(p):
    """Pack all weights/biases (PyTorch layout) into one (12, 17) f32 array."""
    packed = jnp.zeros((P_ROWS, P_COLS), jnp.float32)
    packed = packed.at[:H1, C_W1].set(p["w1"][:, 0])          # (12,)
    packed = packed.at[:H1, C_B1].set(p["b1"])                # (12,)
    packed = packed.at[:H2, C_B2].set(p["b2"])                # (8,)
    packed = packed.at[:H2, C_W3].set(p["w3"][0, :])          # (8,)
    packed = packed.at[0, C_B3].set(p["b3"][0])               # scalar
    packed = packed.at[:H2, C_W2:C_W2 + H1].set(p["w2"])      # (8, 12)
    return packed


def mlp_kernel(x_ref, p_ref, o_ref):
    x = x_ref[...]                            # (1, TB): batch on lanes
    p = p_ref[...]                            # (12, 17) packed params
    tb = x.shape[1]

    # ---- layer 1: relu(w1 * x + b1) -- pure VPU broadcast FMA (K = 1) ------
    w1 = p[:H1, C_W1:C_W1 + 1]                # (12, 1)
    b1 = p[:H1, C_B1:C_B1 + 1]                # (12, 1)
    h1 = jnp.maximum(w1 * x + b1, 0.0)        # (12, TB)

    # ---- layer 2: relu(W2 @ h1 + b2) -- 12-term unrolled VPU FMA -----------
    b2 = p[:H2, C_B2:C_B2 + 1]                # (8, 1)
    acc = jnp.broadcast_to(b2, (H2, tb))      # (8, TB)
    for j in range(H1):                       # static unroll, no MXU round-trip
        acc = acc + p[:H2, C_W2 + j:C_W2 + j + 1] * h1[j:j + 1, :]
    h2 = jnp.maximum(acc, 0.0)                # (8, TB)

    # ---- layer 3: W3 @ h2 + b3 -- multiply + sublane reduction -------------
    w3 = p[:H2, C_W3:C_W3 + 1]                # (8, 1)
    b3 = p[0, C_B3]                           # scalar
    y = jnp.sum(w3 * h2, axis=0, keepdims=True) + b3   # (1, TB), lane-dense
    o_ref[...] = y.astype(o_ref.dtype)


def _choose_tb(n, tb_max):
    """Lane tile: multiple of 128, <= tb_max, and >=2 grid steps when possible
    so both v7x TensorCores get work."""
    tb = min(tb_max, _round_up(n, 128))
    if n > 128 and _cdiv(n, tb) < 2:
        tb = _round_up(_cdiv(n, 2), 128)
    return tb


def mlp_forward(x, params, *, tb_max=2048):
    """x: (N, 1) float32 -> (N, 1) float32.  params: PyTorch-layout dict."""
    n = x.shape[0]
    packed = pack_params(params)

    tb = _choose_tb(n, tb_max)
    n_pad = _round_up(n, tb)
    grid = n_pad // tb

    # (N, 1) -> (1, N): identical data, batch now on the lane axis.
    xr = x.reshape(1, n).astype(jnp.float32)
    if n_pad != n:
        xr = jnp.pad(xr, ((0, 0), (0, n_pad - n)))

    out = pl.pallas_call(
        mlp_kernel,
        out_shape=jax.ShapeDtypeStruct((1, n_pad), jnp.float32),
        grid_spec=pltpu.PrefetchScalarGridSpec(
            num_scalar_prefetch=0,
            grid=(grid,),
            in_specs=[
                pl.BlockSpec((1, tb), lambda i: (0, i)),            # x tile
                pl.BlockSpec((P_ROWS, P_COLS), lambda i: (0, 0)),   # packed params
            ],
            out_specs=pl.BlockSpec((1, tb), lambda i: (0, i)),
        ),
        compiler_params=pltpu.CompilerParams(
            dimension_semantics=("parallel",),
        ),
    )(xr, packed)

    return out[0, :n].reshape(n, 1)


def init_params(key):
    """Deterministic synthetic init (uniform, torch-default scale, torch layout)."""
    ks = jax.random.split(key, 6)

    def lin(kw, kb, fan_in, fan_out):
        bound = 1.0 / (fan_in ** 0.5)
        w = jax.random.uniform(kw, (fan_out, fan_in), jnp.float32, -bound, bound)
        b = jax.random.uniform(kb, (fan_out,), jnp.float32, -bound, bound)
        return w, b

    w1, b1 = lin(ks[0], ks[1], D_IN, H1)
    w2, b2 = lin(ks[2], ks[3], H1, H2)
    w3, b3 = lin(ks[4], ks[5], H2, D_OUT)
    return dict(w1=w1, b1=b1, w2=w2, b2=b2, w3=w3, b3=b3)


def reference_forward(x, p):
    h1 = jnp.maximum(x @ p["w1"].T + p["b1"], 0.0)
    h2 = jnp.maximum(h1 @ p["w2"].T + p["b2"], 0.0)
    return h2 @ p["w3"].T + p["b3"]


if __name__ == "__main__":
    key = jax.random.PRNGKey(0)
    k_param, k_x1, k_x2 = jax.random.split(key, 3)
    params = init_params(k_param)

    # Small batch consistent with Linear(1, ...) input.
    x_small = jax.random.normal(k_x1, (16, D_IN), jnp.float32)
    out_small = jax.block_until_ready(mlp_forward(x_small, params))
    ref_small = reference_forward(x_small, params)
    assert out_small.shape == (16, D_OUT)
    assert jnp.allclose(out_small, ref_small, atol=1e-5, rtol=1e-5)

    # Ragged batch: exercises zero-padding tail + a 2-step parallel grid.
    x_big = jax.random.normal(k_x2, (1000, D_IN), jnp.float32)
    out_big = jax.block_until_ready(mlp_forward(x_big, params))
    ref_big = reference_forward(x_big, params)
    assert out_big.shape == (1000, D_OUT)
    assert jnp.allclose(out_big, ref_big, atol=1e-5, rtol=1e-5)

    print("KERNEL_OK")
</pallas_src>

<mosaic_0001>
module attributes {stable_mosaic.version = 11 : i64} {
  func.func @mlp_kernel(%arg0: i32, %arg1: memref<1x128xf32, #tpu.memory_space<vmem>>, %arg2: memref<12x17xf32, #tpu.memory_space<vmem>>, %arg3: memref<1x128xf32, #tpu.memory_space<vmem>>) attributes {dimension_semantics = [#tpu.dimension_semantics<parallel>], iteration_bounds = array<i64: 1>, scalar_prefetch = 0 : i64, scratch_operands = 0 : i64, tpu.core_type = #tpu.core_type<tc>, window_params = [{transform_indices = @transform_0, window_bounds = array<i64: 1, 128>}, {pipeline_mode = #tpu.pipeline_mode<synchronous>, transform_indices = @transform_1, window_bounds = array<i64: 12, 17>}, {transform_indices = @transform_2, window_bounds = array<i64: 1, 128>}]} {
    %c0 = arith.constant 0 : index
    %c0_0 = arith.constant 0 : index
    %0 = vector.load %arg1[%c0, %c0_0] : memref<1x128xf32, #tpu.memory_space<vmem>>, vector<1x128xf32>
    %c0_1 = arith.constant 0 : index
    %c0_2 = arith.constant 0 : index
    %1 = vector.load %arg2[%c0_1, %c0_2] : memref<12x17xf32, #tpu.memory_space<vmem>>, vector<12x17xf32>
    %2 = vector.extract_strided_slice %1 {offsets = [0, 0], sizes = [12, 1], strides = [1, 1]} : vector<12x17xf32> to vector<12x1xf32>
    %3 = vector.extract_strided_slice %1 {offsets = [0, 1], sizes = [12, 1], strides = [1, 1]} : vector<12x17xf32> to vector<12x1xf32>
    %4 = vector.broadcast %2 : vector<12x1xf32> to vector<12x128xf32>
    %5 = vector.broadcast %0 : vector<1x128xf32> to vector<12x128xf32>
    %6 = arith.mulf %4, %5 : vector<12x128xf32>
    %7 = vector.broadcast %3 : vector<12x1xf32> to vector<12x128xf32>
    %8 = arith.addf %6, %7 : vector<12x128xf32>
    %cst = arith.constant 0.000000e+00 : f32
    %9 = vector.broadcast %cst : f32 to vector<12x128xf32>
    %10 = arith.maximumf %8, %9 : vector<12x128xf32>
    %11 = vector.extract_strided_slice %1 {offsets = [0, 2], sizes = [8, 1], strides = [1, 1]} : vector<12x17xf32> to vector<8x1xf32>
    %12 = vector.shape_cast %11 : vector<8x1xf32> to vector<8x1xf32>
    %13 = vector.broadcast %12 : vector<8x1xf32> to vector<8x128xf32>
    %14 = vector.extract_strided_slice %1 {offsets = [0, 5], sizes = [8, 1], strides = [1, 1]} : vector<12x17xf32> to vector<8x1xf32>
    %15 = vector.extract_strided_slice %10 {offsets = [0, 0], sizes = [1, 128], strides = [1, 1]} : vector<12x128xf32> to vector<1x128xf32>
    %16 = vector.broadcast %14 : vector<8x1xf32> to vector<8x128xf32>
    %17 = vector.broadcast %15 : vector<1x128xf32> to vector<8x128xf32>
    %18 = arith.mulf %16, %17 : vector<8x128xf32>
    %19 = arith.addf %13, %18 : vector<8x128xf32>
    %20 = vector.extract_strided_slice %1 {offsets = [0, 6], sizes = [8, 1], strides = [1, 1]} : vector<12x17xf32> to vector<8x1xf32>
    %21 = vector.extract_strided_slice %10 {offsets = [1, 0], sizes = [1, 128], strides = [1, 1]} : vector<12x128xf32> to vector<1x128xf32>
    %22 = vector.broadcast %20 : vector<8x1xf32> to vector<8x128xf32>
    %23 = vector.broadcast %21 : vector<1x128xf32> to vector<8x128xf32>
    %24 = arith.mulf %22, %23 : vector<8x128xf32>
    %25 = arith.addf %19, %24 : vector<8x128xf32>
    %26 = vector.extract_strided_slice %1 {offsets = [0, 7], sizes = [8, 1], strides = [1, 1]} : vector<12x17xf32> to vector<8x1xf32>
    %27 = vector.extract_strided_slice %10 {offsets = [2, 0], sizes = [1, 128], strides = [1, 1]} : vector<12x128xf32> to vector<1x128xf32>
    %28 = vector.broadcast %26 : vector<8x1xf32> to vector<8x128xf32>
    %29 = vector.broadcast %27 : vector<1x128xf32> to vector<8x128xf32>
    %30 = arith.mulf %28, %29 : vector<8x128xf32>
    %31 = arith.addf %25, %30 : vector<8x128xf32>
    %32 = vector.extract_strided_slice %1 {offsets = [0, 8], sizes = [8, 1], strides = [1, 1]} : vector<12x17xf32> to vector<8x1xf32>
    %33 = vector.extract_strided_slice %10 {offsets = [3, 0], sizes = [1, 128], strides = [1, 1]} : vector<12x128xf32> to vector<1x128xf32>
    %34 = vector.broadcast %32 : vector<8x1xf32> to vector<8x128xf32>
    %35 = vector.broadcast %33 : vector<1x128xf32> to vector<8x128xf32>
    %36 = arith.mulf %34, %35 : vector<8x128xf32>
    %37 = arith.addf %31, %36 : vector<8x128xf32>
    %38 = vector.extract_strided_slice %1 {offsets = [0, 9], sizes = [8, 1], strides = [1, 1]} : vector<12x17xf32> to vector<8x1xf32>
    %39 = vector.extract_strided_slice %10 {offsets = [4, 0], sizes = [1, 128], strides = [1, 1]} : vector<12x128xf32> to vector<1x128xf32>
    %40 = vector.broadcast %38 : vector<8x1xf32> to vector<8x128xf32>
    %41 = vector.broadcast %39 : vector<1x128xf32> to vector<8x128xf32>
    %42 = arith.mulf %40, %41 : vector<8x128xf32>
    %43 = arith.addf %37, %42 : vector<8x128xf32>
    %44 = vector.extract_strided_slice %1 {offsets = [0, 10], sizes = [8, 1], strides = [1, 1]} : vector<12x17xf32> to vector<8x1xf32>
    %45 = vector.extract_strided_slice %10 {offsets = [5, 0], sizes = [1, 128], strides = [1, 1]} : vector<12x128xf32> to vector<1x128xf32>
    %46 = vector.broadcast %44 : vector<8x1xf32> to vector<8x128xf32>
    %47 = vector.broadcast %45 : vector<1x128xf32> to vector<8x128xf32>
    %48 = arith.mulf %46, %47 : vector<8x128xf32>
    %49 = arith.addf %43, %48 : vector<8x128xf32>
    %50 = vector.extract_strided_slice %1 {offsets = [0, 11], sizes = [8, 1], strides = [1, 1]} : vector<12x17xf32> to vector<8x1xf32>
    %51 = vector.extract_strided_slice %10 {offsets = [6, 0], sizes = [1, 128], strides = [1, 1]} : vector<12x128xf32> to vector<1x128xf32>
    %52 = vector.broadcast %50 : vector<8x1xf32> to vector<8x128xf32>
    %53 = vector.broadcast %51 : vector<1x128xf32> to vector<8x128xf32>
    %54 = arith.mulf %52, %53 : vector<8x128xf32>
    %55 = arith.addf %49, %54 : vector<8x128xf32>
    %56 = vector.extract_strided_slice %1 {offsets = [0, 12], sizes = [8, 1], strides = [1, 1]} : vector<12x17xf32> to vector<8x1xf32>
    %57 = vector.extract_strided_slice %10 {offsets = [7, 0], sizes = [1, 128], strides = [1, 1]} : vector<12x128xf32> to vector<1x128xf32>
    %58 = vector.broadcast %56 : vector<8x1xf32> to vector<8x128xf32>
    %59 = vector.broadcast %57 : vector<1x128xf32> to vector<8x128xf32>
    %60 = arith.mulf %58, %59 : vector<8x128xf32>
    %61 = arith.addf %55, %60 : vector<8x128xf32>
    %62 = vector.extract_strided_slice %1 {offsets = [0, 13], sizes = [8, 1], strides = [1, 1]} : vector<12x17xf32> to vector<8x1xf32>
    %63 = vector.extract_strided_slice %10 {offsets = [8, 0], sizes = [1, 128], strides = [1, 1]} : vector<12x128xf32> to vector<1x128xf32>
    %64 = vector.broadcast %62 : vector<8x1xf32> to vector<8x128xf32>
    %65 = vector.broadcast %63 : vector<1x128xf32> to vector<8x128xf32>
    %66 = arith.mulf %64, %65 : vector<8x128xf32>
    %67 = arith.addf %61, %66 : vector<8x128xf32>
    %68 = vector.extract_strided_slice %1 {offsets = [0, 14], sizes = [8, 1], strides = [1, 1]} : vector<12x17xf32> to vector<8x1xf32>
    %69 = vector.extract_strided_slice %10 {offsets = [9, 0], sizes = [1, 128], strides = [1, 1]} : vector<12x128xf32> to vector<1x128xf32>
    %70 = vector.broadcast %68 : vector<8x1xf32> to vector<8x128xf32>
    %71 = vector.broadcast %69 : vector<1x128xf32> to vector<8x128xf32>
    %72 = arith.mulf %70, %71 : vector<8x128xf32>
    %73 = arith.addf %67, %72 : vector<8x128xf32>
    %74 = vector.extract_strided_slice %1 {offsets = [0, 15], sizes = [8, 1], strides = [1, 1]} : vector<12x17xf32> to vector<8x1xf32>
    %75 = vector.extract_strided_slice %10 {offsets = [10, 0], sizes = [1, 128], strides = [1, 1]} : vector<12x128xf32> to vector<1x128xf32>
    %76 = vector.broadcast %74 : vector<8x1xf32> to vector<8x128xf32>
    %77 = vector.broadcast %75 : vector<1x128xf32> to vector<8x128xf32>
    %78 = arith.mulf %76, %77 : vector<8x128xf32>
    %79 = arith.addf %73, %78 : vector<8x128xf32>
    %80 = vector.extract_strided_slice %1 {offsets = [0, 16], sizes = [8, 1], strides = [1, 1]} : vector<12x17xf32> to vector<8x1xf32>
    %81 = vector.extract_strided_slice %10 {offsets = [11, 0], sizes = [1, 128], strides = [1, 1]} : vector<12x128xf32> to vector<1x128xf32>
    %82 = vector.broadcast %80 : vector<8x1xf32> to vector<8x128xf32>
    %83 = vector.broadcast %81 : vector<1x128xf32> to vector<8x128xf32>
    %84 = arith.mulf %82, %83 : vector<8x128xf32>
    %85 = arith.addf %79, %84 : vector<8x128xf32>
    %cst_3 = arith.constant 0.000000e+00 : f32
    %86 = vector.broadcast %cst_3 : f32 to vector<8x128xf32>
    %87 = arith.maximumf %85, %86 : vector<8x128xf32>
    %88 = vector.extract_strided_slice %1 {offsets = [0, 3], sizes = [8, 1], strides = [1, 1]} : vector<12x17xf32> to vector<8x1xf32>
    %89 = vector.extract_strided_slice %1 {offsets = [0, 4], sizes = [1, 1], strides = [1, 1]} : vector<12x17xf32> to vector<1x1xf32>
    %90 = vector.extract %89[0, 0] : f32 from vector<1x1xf32>
    %91 = vector.broadcast %88 : vector<8x1xf32> to vector<8x128xf32>
    %92 = arith.mulf %91, %87 : vector<8x128xf32>
    %cst_4 = arith.constant dense<0.000000e+00> : vector<128xf32>
    %93 = vector.multi_reduction <add>, %92, %cst_4 [0] : vector<8x128xf32> to vector<128xf32>
    %94 = vector.shape_cast %93 : vector<128xf32> to vector<1x128xf32>
    %95 = vector.broadcast %90 : f32 to vector<1x128xf32>
    %96 = arith.addf %94, %95 : vector<1x128xf32>
    %c0_5 = arith.constant 0 : index
    %c0_6 = arith.constant 0 : index
    %97 = vector.load %arg3[%c0_5, %c0_6] : memref<1x128xf32, #tpu.memory_space<vmem>>, vector<1x128xf32>
    tpu.vector_store %arg3[%c0_5, %c0_6], %96 {strides = array<i32>} : memref<1x128xf32, #tpu.memory_space<vmem>>, vector<1x128xf32>,
    return
  }
  func.func @transform_0(%arg0: i32) -> (i32, i32) {
    %c0_i32 = arith.constant 0 : i32
    %c0_i32_0 = arith.constant 0 : i32
    return %c0_i32, %arg0 : i32, i32
  }
  func.func @transform_1(%arg0: i32) -> (i32, i32) {
    %c0_i32 = arith.constant 0 : i32
    %c0_i32_0 = arith.constant 0 : i32
    %c0_i32_1 = arith.constant 0 : i32
    return %c0_i32, %c0_i32_0 : i32, i32
  }
  func.func @transform_2(%arg0: i32) -> (i32, i32) {
    %c0_i32 = arith.constant 0 : i32
    %c0_i32_0 = arith.constant 0 : i32
    return %c0_i32, %arg0 : i32, i32
  }
}

</mosaic_0001>

<bundles_post_ra>
// kernel: tpu_custom_call.1
= control target key start
LH: loop header
LB: loop body
LE: loop exit
PB: predicated region body
PF: predicated region fallthrough
CT: control target
= control target key end

     0   :  { %7 = vsyncpa [#allocation3], 0  ;;  %s363_s0 = inlined_call_operand.hbm [shape: f32[1,128], index: 0, kind: input, shape index: {}]   ;;  %s364_s1 = inlined_call_operand.hbm [shape: f32[12,17], index: 1, kind: input, shape index: {}]   ;;  %s365_s2 = inlined_call_operand.hbm [shape: f32[1,128], index: 2, kind: output, shape index: {}]  }
   0x1   :  { %8 = vsyncpa [#allocation6], 0 }
   0x2   :  { %9 = vsyncpa [#allocation4], 0  ;;  %s15_s11 = sshll.u32 %s363_s0, 4  ;;  %s317_s12 = smov [#allocation2]   ;;  %s16_s11 = int_to_ptr.hbm [resolvable:$true] %s15_s11 }
   0x3   :  { %s17_s13 = sshll.u32 %s317_s12, 4  ;;  %s25_s16 = sshll.u32 %s364_s1, 4  ;;  %s18_s13 = int_to_ptr.vmem [resolvable:$true] %s17_s13  ;;  %s26_s16 = int_to_ptr.hbm [resolvable:$true] %s25_s16 }
   0x4   :  { %20 = dma.hbm_to_vmem [thread:$0]  %s16_s11, 16, %s18_s13, [#allocation3]  }
   0x5   :  { %s318_s17 = smov [#allocation5]   ;;  %s319_s19 = smov 128  }
   0x6   :  { %s27_s18 = sshll.u32 %s318_s17, 4  ;;  %s320_s20 = smov 8   ;;  %s28_s18 = int_to_ptr.vmem [resolvable:$true] %s27_s18 }
   0x7   :  { %33 = dma.hbm_to_vmem [thread:$0]  %s26_s16, 256, %s28_s18, [#allocation6], %s319_s19, %s319_s19, %s320_s20  }
   0x8   :  { %311 = dma.done.wait [#allocation3], 16  }
   0x9   :  { %312 = vsyncadd [#allocation3], 4294967280 }
   0xa   :  { %313 = dma.done.wait [#allocation6], 256  }
   0xb   :  { %314 = vsyncadd [#allocation6], 4294967040  ;;  %v321_v0 = vmov 1   ;;  %v322_v1 = vmov 0   ;;  %v43_v2 = vld [vmem:[#allocation5] sm:$0xff]  ;;  %v323_v4 = vmov 5  }
   0xc   :  { %222 = vset.pattern.permute.xlu2 %v321_v0  ;;  %221 = vset.pattern.permute.xlu1 %v321_v0  ;;  %v44_v3 = vld [vmem:[#allocation5 + $0x8] sm:$0xf]  ;;  %s324_s0 = smov 124   ;;  %v325_v5 = vmov 6   ;;  %v326_v6 = vmov 2   ;;  %v327_v7 = vmov 7  }
   0xd   :  { %220 = vset.pattern.permute.xlu0 %v322_v1  ;;  %65 = vperm.xlu2 %222, %v44_v3   ;;  %v328_v8 = vmov 8   ;;  %v329_v9 = vmov 10   ;;  %v330_v10 = vmov 9   ;;  %v331_v11 = vmov 11   ;;  %v238_v19 = vld [vmem:[#allocation2] ss:$0 sm:$0xff] }
   0xe   :  { %61 = vperm.xlu1 %221, %v43_v2   ;;  %47 = vperm.xlu0 %220, %v43_v2   ;;  %v332_v12 = vmov 15   ;;  %v333_v13 = vmov 12   ;;  %v334_v14 = vmov 13   ;;  %v335_v15 = vmov 14   ;;  %s338_s21 = smov [#allocation7]   ;;  %s185_s25 = sshll.u32 %s365_s2, 4  ;;  %s186_s25 = int_to_ptr.hbm [resolvable:$true] %s185_s25 }
   0xf   :  { %v336_v16 = vmov 3   ;;  %v337_v17 = vmov 16   ;;  %s183_s22 = sshll.u32 %s338_s21, 4  ;;  %s184_s22 = int_to_ptr.vmem [resolvable:$true] %s183_s22 }
  0x15   :  { %223 = vset.pattern.permute.xlu2 %v323_v4 }
  0x16   :  { %161 = vrot.lane.b32.xlu1 %v43_v2, %s324_s0  ;;  %52 = vperm.xlu0 %220, %v44_v3  }
  0x17   :  { %77 = vperm.xlu2 %223, %v43_v2   ;;  %225 = vset.pattern.permute.xlu1 %v325_v5 }
  0x1e   :  { %84 = vperm.xlu1 %225, %v43_v2   ;;  %224 = vset.pattern.permute.xlu0 %v326_v6 }
  0x1f   :  { %226 = vset.pattern.permute.xlu2 %v327_v7  ;;  %73 = vperm.xlu0 %224, %v43_v2  }
  0x20   :  { %91 = vperm.xlu2 %226, %v43_v2  }
  0x26   :  { %227 = vset.pattern.permute.xlu1 %v328_v8 }
  0x27   :  { %98 = vperm.xlu1 %227, %v43_v2   ;;  %229 = vset.pattern.permute.xlu0 %v329_v9 }
  0x28   :  { %228 = vset.pattern.permute.xlu2 %v330_v10  ;;  %112 = vperm.xlu0 %229, %v43_v2  }
  0x29   :  { %105 = vperm.xlu2 %228, %v43_v2  }
  0x2f   :  { %230 = vset.pattern.permute.xlu1 %v331_v11 }
  0x30   :  { %119 = vperm.xlu1 %230, %v43_v2   ;;  %234 = vset.pattern.permute.xlu0 %v332_v12 }
  0x31   :  { %231 = vset.pattern.permute.xlu2 %v333_v13  ;;  %147 = vperm.xlu0 %234, %v43_v2  }
  0x32   :  { %126 = vperm.xlu2 %231, %v43_v2  }
  0x38   :  { %232 = vset.pattern.permute.xlu1 %v334_v14 }
  0x39   :  { %133 = vperm.xlu1 %232, %v43_v2   ;;  %237 = vset.pattern.permute.xlu0 %v336_v16 }
  0x3a   :  { %233 = vset.pattern.permute.xlu2 %v335_v15 }
  0x3b   :  { %140 = vperm.xlu2 %233, %v43_v2  }
  0x41   :  { %235 = vset.pattern.permute.xlu1 %v337_v17 }
  0x42   :  { %154 = vperm.xlu1 %235, %v43_v2  }
  0x43   :  { %236 = vset.pattern.permute.xlu2 %v336_v16 }
  0x44   :  { %165 = vperm.xlu2 %236, %v43_v2  }
  0x67   :  { %v66_v18 = vpop.permute.xlu2 %65 }
  0x71   :  { %v78_v23 = vpop.permute.xlu2 %77 }
  0x7a   :  { %v92_v28 = vpop.permute.xlu2 %91 }
  0x80   :  { %v62_v20 = vpop.permute.xlu1 %61  ;;  %v48_v21 = vpop.permute.xlu0 %47 }
  0x81   :  { %v58_v22 = vmul.f32 %v238_v19, %v48_v21 }
  0x83   :  { %v68_v24 = vadd.f32 %v62_v20, %v58_v22  ;;  %v106_v37 = vpop.permute.xlu2 %105 }
  0x85   :  { %v70_v27 = vmax.f32 %v68_v24, 0.0 }
  0x87   :  { %v80_v29 = vperm.slane %v70_v27, 0  ;;  %v87_v31 = vperm.slane %v70_v27, 1  ;;  %v94_v36 = vperm.slane %v70_v27, 2  ;;  %v101_v39 = vperm.slane %v70_v27, 3 }
  0x88   :  { %v162_v25 = vpop.permute.xlu1 %161  ;;  %v53_v26 = vpop.permute.xlu0 %52  ;;  %v108_v43 = vperm.slane %v70_v27, 4  ;;  %v115_v52 = vperm.slane %v70_v27, 5  ;;  %v122_v54 = vperm.slane %v70_v27, 6  ;;  %v129_v59 = vperm.slane %v70_v27, 7 }
  0x89   :  { %196 = vpush %v162_v25  ;;  %v81_v33 = vmul.f32 %v80_v29, %v78_v23  ;;  %v95_v41 = vmul.f32 %v94_v36, %v92_v28  ;;  %v59_v45 = vmul.f32 %v238_v19, %v53_v26 }
  0x8a   :  { %v109_v47 = vmul.f32 %v108_v43, %v106_v37 }
  0x8b   :  { %v69_v49 = vadd.f32 %v66_v18, %v59_v45 }
  0x8c   :  { %v127_v50 = vpop.permute.xlu2 %126 }
  0x8d   :  { %v71_v57 = vmax.f32 %v69_v49, 0.0  ;;  %v130_v61 = vmul.f32 %v129_v59, %v127_v50 }
  0x8f   :  { %v136_v62 = vperm.slane %v71_v57, 0  ;;  %v143_v3 = vperm.slane %v71_v57, 1  ;;  %v150_v7 = vperm.slane %v71_v57, 2  ;;  %v157_v10 = vperm.slane %v71_v57, 3 }
  0x90   :  { %v85_v30 = vpop.permute.xlu1 %84 }
  0x91   :  { %v74_v32 = vpop.permute.xlu0 %73  ;;  %v88_v34 = vmul.f32 %v87_v31, %v85_v30 }
  0x92   :  { %v82_v35 = vadd.f32 %v81_v33, %v74_v32 }
  0x94   :  { %v89_v38 = vadd.f32 %v88_v34, %v82_v35 }
  0x95   :  { %v141_v0 = vpop.permute.xlu2 %140 }
  0x96   :  { %v96_v44 = vadd.f32 %v95_v41, %v89_v38  ;;  %v144_v5 = vmul.f32 %v143_v3, %v141_v0 }
  0x99   :  { %v99_v40 = vpop.permute.xlu1 %98 }
  0x9a   :  { %v102_v42 = vmul.f32 %v101_v39, %v99_v40  ;;  %v113_v48 = vpop.permute.xlu0 %112 }
  0x9b   :  { %v116_v55 = vmul.f32 %v115_v52, %v113_v48 }
  0x9c   :  { %v103_v46 = vadd.f32 %v102_v42, %v96_v44 }
  0x9e   :  { %v110_v51 = vadd.f32 %v109_v47, %v103_v46  ;;  %v166_v15 = vpop.permute.xlu2 %165 }
  0xa0   :  { %v117_v58 = vadd.f32 %v116_v55, %v110_v51 }
  0xa2   :  { %v120_v53 = vpop.permute.xlu1 %119 }
  0xa3   :  { %v123_v56 = vmul.f32 %v122_v54, %v120_v53  ;;  %v148_v6 = vpop.permute.xlu0 %147 }
  0xa4   :  { %v151_v9 = vmul.f32 %v150_v7, %v148_v6 }
  0xa5   :  { %v124_v60 = vadd.f32 %v123_v56, %v117_v58 }
  0xa7   :  { %v131_v1 = vadd.f32 %v130_v61, %v124_v60 }
  0xab   :  { %v134_v63 = vpop.permute.xlu1 %133 }
  0xac   :  { %v137_v2 = vmul.f32 %v136_v62, %v134_v63 }
  0xae   :  { %v138_v4 = vadd.f32 %v137_v2, %v131_v1 }
  0xb0   :  { %v145_v8 = vadd.f32 %v144_v5, %v138_v4 }
  0xb2   :  { %v152_v12 = vadd.f32 %v151_v9, %v145_v8 }
  0xb4   :  { %v155_v11 = vpop.permute.xlu1 %154 }
  0xb5   :  { %v158_v13 = vmul.f32 %v157_v10, %v155_v11 }
  0xb7   :  { %v159_v14 = vadd.f32 %v158_v13, %v152_v12 }
  0xb9   :  { %v160_v16 = vmax.f32 %v159_v14, 0.0 }
  0xba   :  { %s197_s1 = spop %196 }
  0xbb   :  { %v168_v17 = vmul.f32 %v166_v15, %v160_v16  ;;  %v175_v24 = vstv %s197_s1 }
  0xbd   :  { %v169_v18 = vrot.slane %v168_v17, 4 }
  0xbf   :  { %v170_v19 = vadd.f32 %v169_v18, %v168_v17 }
  0xc1   :  { %v171_v20 = vrot.slane %v170_v19, 2 }
  0xc3   :  { %v172_v21 = vadd.f32 %v171_v20, %v170_v19 }
  0xc5   :  { %v173_v22 = vrot.slane %v172_v21, 1 }
  0xc7   :  { %v174_v23 = vadd.f32 %v173_v22, %v172_v21 }
  0xc9   :  { %v176_v25 = vadd.f32 %v175_v24, %v174_v23 }
  0xcb   :  { %177 = vst [vmem:[#allocation7] sm:$0x1] %v176_v25 }
  0xcc   :  { %188 = dma.vmem_to_hbm [thread:$0]  %s184_s22, 16, %s186_s25, [#allocation4]  }
  0xcd   :  { %315 = dma.done.wait [#allocation4], 16  }
  0xce   :  { %316 = vsyncadd [#allocation4], 4294967280 }
  0xcf   :  { %193 = vsyncpa [#allocation3], 1 }
  0xd0   :  { %194 = vsyncpa [#allocation6], 1 }
  0xd1   :  { %195 = vsyncpa [#allocation4], 1 }

</bundles_post_ra>
